<compile_context>
chip_gen: v7x
topology: tpu7x:2x2x1
jax: 0.10.0
libtpu: 0.0.40
codegen_flags: <defaults>
</compile_context>

<pallas_src>
import functools

import jax
import jax.numpy as jnp
from jax.experimental import pallas as pl
from jax.experimental.pallas import tpu as pltpu


def _round_up(n, m):
    return ((n + m - 1) // m) * m


def encoder_kernel(x_ref,
                   w1_ref, b1_ref,
                   w2_ref, b2_ref,
                   wh_ref, bh_ref,
                   out_ref,
                   *, latent):
    """One batch tile: 2x (Linear+ReLU) then fused [mu | logsigma | pad] head."""
    x = x_ref[...].astype(w1_ref.dtype)                  # f32 -> bf16 cast in-kernel (free)

    # ---- prev_network: Linear -> ReLU -> Linear -> ReLU (MXU, f32 accumulate) ----
    h1 = jnp.dot(x, w1_ref[...], preferred_element_type=jnp.float32) + b1_ref[...]
    h1 = jnp.maximum(h1, 0.0).astype(w2_ref.dtype)

    h2 = jnp.dot(h1, w2_ref[...], preferred_element_type=jnp.float32) + b2_ref[...]
    h2 = jnp.maximum(h2, 0.0).astype(wh_ref.dtype)

    # ---- fused gauss heads: one lane-dense (TB, Wp) matmul, Wp = round_up(2L, 128) ----
    head = jnp.dot(h2, wh_ref[...], preferred_element_type=jnp.float32) + bh_ref[...]

    # cols [0, L)      -> mu (identity)
    # cols [L, 2L)     -> sigma = exp(logsigma)
    # cols [2L, Wp)    -> padding (exp(0)=1, sliced off in wrapper)
    col = jax.lax.broadcasted_iota(jnp.int32, head.shape, dimension=1)
    head = jnp.where(col >= latent, jnp.exp(head), head)

    # one unmasked lane-dense store
    out_ref[...] = head.astype(out_ref.dtype)


def prepare_params(params, *, param_dtype=jnp.bfloat16):
    """One-time pad + cast of weights/biases (hoisted out of the per-call path)."""
    D, H1 = params["w1"].shape
    H2 = params["w2"].shape[1]
    L = params["wmu"].shape[1]

    H1p = _round_up(H1, 128)
    H2p = _round_up(H2, 128)
    Wp = _round_up(2 * L, 128)                            # packed [mu | logsigma | pad] slab

    def pad_w(w, rp, cp):
        return jnp.zeros((rp, cp), param_dtype).at[:w.shape[0], :w.shape[1]].set(
            w.astype(param_dtype))

    def pad_b(b, cp):
        return jnp.zeros((1, cp), jnp.float32).at[:, :b.shape[1]].set(
            b.astype(jnp.float32))

    w1 = pad_w(params["w1"], D, H1p)                      # rows stay = D (x is unpadded in D)
    b1 = pad_b(params["b1"], H1p)
    w2 = pad_w(params["w2"], H1p, H2p)
    b2 = pad_b(params["b2"], H2p)

    wh = jnp.zeros((H2p, Wp), param_dtype)
    wh = wh.at[:H2, :L].set(params["wmu"].astype(param_dtype))
    wh = wh.at[:H2, L:2 * L].set(params["wls"].astype(param_dtype))
    bh = jnp.zeros((1, Wp), jnp.float32)
    bh = bh.at[:, :L].set(params["bmu"].astype(jnp.float32))
    bh = bh.at[:, L:2 * L].set(params["bls"].astype(jnp.float32))

    return {
        "w1": w1, "b1": b1, "w2": w2, "b2": b2, "wh": wh, "bh": bh,
        "latent": L, "d_in": D,
    }


def simple_gauss_vae_fc_encoder(x, prepared, *, tb_max=2048, out_dtype=jnp.bfloat16):
    """x: (B, D_in) float32. prepared: output of prepare_params()."""
    B, D = x.shape
    assert D == prepared["d_in"], "x feature dim does not match prepared params"
    L = prepared["latent"]
    w1, b1 = prepared["w1"], prepared["b1"]
    w2, b2 = prepared["w2"], prepared["b2"]
    wh, bh = prepared["wh"], prepared["bh"]
    H1p = w1.shape[1]
    H2p = w2.shape[1]
    Wp = wh.shape[1]

    # ---- batch tiling: big tiles (amortize per-step overhead), multiple of 16 ----
    TB = min(tb_max, _round_up(B, 16))
    # Keep >= 2 grid steps when the batch allows, so ("parallel",) uses both v7x TCs.
    if _round_up(B, TB) // TB < 2 and TB >= 32:
        TB = _round_up(TB // 2, 16)
    Bp = _round_up(B, TB)

    # Only pad the batch axis if needed; x stays f32 (cast happens in-kernel).
    xp = x if Bp == B else jnp.zeros((Bp, D), x.dtype).at[:B].set(x)

    grid = (Bp // TB,)

    flops = 2 * Bp * (D * H1p + H1p * H2p + H2p * Wp)
    bytes_accessed = int(
        Bp * D * x.dtype.itemsize
        + (w1.size + w2.size + wh.size) * jnp.dtype(w1.dtype).itemsize
        + (b1.size + b2.size + bh.size) * 4
        + Bp * Wp * jnp.dtype(out_dtype).itemsize)

    out = pl.pallas_call(
        functools.partial(encoder_kernel, latent=L),
        out_shape=jax.ShapeDtypeStruct((Bp, Wp), out_dtype),
        grid=grid,
        in_specs=[
            pl.BlockSpec((TB, D), lambda i: (i, 0)),        # x tile (pipelined)
            pl.BlockSpec((D, H1p), lambda i: (0, 0)),       # weights stay resident
            pl.BlockSpec((1, H1p), lambda i: (0, 0)),
            pl.BlockSpec((H1p, H2p), lambda i: (0, 0)),
            pl.BlockSpec((1, H2p), lambda i: (0, 0)),
            pl.BlockSpec((H2p, Wp), lambda i: (0, 0)),
            pl.BlockSpec((1, Wp), lambda i: (0, 0)),
        ],
        out_specs=pl.BlockSpec((TB, Wp), lambda i: (i, 0)),
        compiler_params=pltpu.CompilerParams(
            dimension_semantics=("parallel",),              # batch axis shards across cores
            vmem_limit_bytes=48 * 1024 * 1024,              # raise over v5e/v6e defaults, fits v7x
        ),
        cost_estimate=pl.CostEstimate(
            flops=flops,
            transcendentals=Bp * (Wp - L),
            bytes_accessed=bytes_accessed,
        ),
    )(xp, w1, b1, w2, b2, wh, bh)

    mu = out[:B, :L]
    sigma = out[:B, L:2 * L]
    return mu, sigma


def init_params(key, d_in, h1, h2, latent):
    """Deterministic synthetic parameters (shapes match the PyTorch module, f32)."""
    ks = jax.random.split(key, 8)
    scale = 0.1

    def w(k, fan_in, fan_out):
        return (scale * jax.random.normal(k, (fan_in, fan_out))).astype(jnp.float32)

    def b(k, fan_out):
        return (scale * jax.random.normal(k, (1, fan_out))).astype(jnp.float32)

    return {
        "w1": w(ks[0], d_in, h1), "b1": b(ks[1], h1),
        "w2": w(ks[2], h1, h2), "b2": b(ks[3], h2),
        "wmu": w(ks[4], h2, latent), "bmu": b(ks[5], latent),
        "wls": w(ks[6], h2, latent), "bls": b(ks[7], latent),
    }


def reference_forward(x, p):
    """Pure-JAX f32 reference (mirrors the PyTorch forward exactly)."""
    h = jnp.maximum(x @ p["w1"] + p["b1"], 0.0)
    h = jnp.maximum(h @ p["w2"] + p["b2"], 0.0)
    mu = h @ p["wmu"] + p["bmu"]
    sigma = jnp.exp(h @ p["wls"] + p["bls"])
    return mu, sigma


if __name__ == "__main__":
    B, D_IN, H1, H2, LATENT = 8, 32, 64, 64, 16

    key = jax.random.PRNGKey(0)
    k_x, k_p = jax.random.split(key)
    x = jax.random.normal(k_x, (B, D_IN), dtype=jnp.float32)
    params = init_params(k_p, D_IN, H1, H2, LATENT)

    prepared = prepare_params(params)                 # one-time pad + cast
    mu, sigma = simple_gauss_vae_fc_encoder(x, prepared)
    jax.block_until_ready((mu, sigma))

    mu_ref, sigma_ref = reference_forward(x, params)
    assert mu.shape == (B, LATENT) and sigma.shape == (B, LATENT)
    # bf16 matmul operands / bf16 output (f32 accumulate) -> loose tolerance vs f32 reference.
    assert jnp.allclose(mu.astype(jnp.float32), mu_ref, atol=5e-2, rtol=5e-2), "mu mismatch"
    assert jnp.allclose(sigma.astype(jnp.float32), sigma_ref, atol=5e-2, rtol=5e-2), "sigma mismatch"

    print("KERNEL_OK")
</pallas_src>

<mosaic_0001>
module attributes {stable_mosaic.version = 11 : i64} {
  func.func @encoder_kernel(%arg0: i32, %arg1: memref<16x32xf32, #tpu.memory_space<vmem>>, %arg2: memref<32x128xbf16, #tpu.memory_space<vmem>>, %arg3: memref<1x128xf32, #tpu.memory_space<vmem>>, %arg4: memref<128x128xbf16, #tpu.memory_space<vmem>>, %arg5: memref<1x128xf32, #tpu.memory_space<vmem>>, %arg6: memref<128x128xbf16, #tpu.memory_space<vmem>>, %arg7: memref<1x128xf32, #tpu.memory_space<vmem>>, %arg8: memref<16x128xbf16, #tpu.memory_space<vmem>>) attributes {dimension_semantics = [#tpu.dimension_semantics<parallel>], iteration_bounds = array<i64: 1>, scalar_prefetch = 0 : i64, scratch_operands = 0 : i64, tpu.core_type = #tpu.core_type<tc>, window_params = [{transform_indices = @transform_0, window_bounds = array<i64: 16, 32>}, {pipeline_mode = #tpu.pipeline_mode<synchronous>, transform_indices = @transform_1, window_bounds = array<i64: 32, 128>}, {pipeline_mode = #tpu.pipeline_mode<synchronous>, transform_indices = @transform_2, window_bounds = array<i64: 1, 128>}, {pipeline_mode = #tpu.pipeline_mode<synchronous>, transform_indices = @transform_3, window_bounds = array<i64: 128, 128>}, {pipeline_mode = #tpu.pipeline_mode<synchronous>, transform_indices = @transform_4, window_bounds = array<i64: 1, 128>}, {pipeline_mode = #tpu.pipeline_mode<synchronous>, transform_indices = @transform_5, window_bounds = array<i64: 128, 128>}, {pipeline_mode = #tpu.pipeline_mode<synchronous>, transform_indices = @transform_6, window_bounds = array<i64: 1, 128>}, {transform_indices = @transform_7, window_bounds = array<i64: 16, 128>}]} {
    %c0 = arith.constant 0 : index
    %c0_0 = arith.constant 0 : index
    %0 = vector.load %arg1[%c0, %c0_0] : memref<16x32xf32, #tpu.memory_space<vmem>>, vector<16x32xf32>
    %1 = arith.truncf %0 : vector<16x32xf32> to vector<16x32xbf16>
    %c0_1 = arith.constant 0 : index
    %c0_2 = arith.constant 0 : index
    %2 = vector.load %arg2[%c0_1, %c0_2] : memref<32x128xbf16, #tpu.memory_space<vmem>>, vector<32x128xbf16>
    %cst = arith.constant dense<0.000000e+00> : vector<16x128xf32>
    %3 = tpu.matmul %1, %2, %cst {dimension_numbers = #tpu.dot_dimension_numbers<[1], [0], [0], [1], [0, 0, 1, 1], [], []>} : vector<16x32xbf16>, vector<32x128xbf16>, vector<16x128xf32> -> vector<16x128xf32>
    %c0_3 = arith.constant 0 : index
    %c0_4 = arith.constant 0 : index
    %4 = vector.load %arg3[%c0_3, %c0_4] : memref<1x128xf32, #tpu.memory_space<vmem>>, vector<1x128xf32>
    %5 = vector.broadcast %4 : vector<1x128xf32> to vector<16x128xf32>
    %6 = arith.addf %3, %5 : vector<16x128xf32>
    %cst_5 = arith.constant 0.000000e+00 : f32
    %7 = vector.broadcast %cst_5 : f32 to vector<16x128xf32>
    %8 = arith.maximumf %6, %7 : vector<16x128xf32>
    %9 = arith.truncf %8 : vector<16x128xf32> to vector<16x128xbf16>
    %c0_6 = arith.constant 0 : index
    %c0_7 = arith.constant 0 : index
    %10 = vector.load %arg4[%c0_6, %c0_7] : memref<128x128xbf16, #tpu.memory_space<vmem>>, vector<128x128xbf16>
    %cst_8 = arith.constant dense<0.000000e+00> : vector<16x128xf32>
    %11 = tpu.matmul %9, %10, %cst_8 {dimension_numbers = #tpu.dot_dimension_numbers<[1], [0], [0], [1], [0, 0, 1, 1], [], []>} : vector<16x128xbf16>, vector<128x128xbf16>, vector<16x128xf32> -> vector<16x128xf32>
    %c0_9 = arith.constant 0 : index
    %c0_10 = arith.constant 0 : index
    %12 = vector.load %arg5[%c0_9, %c0_10] : memref<1x128xf32, #tpu.memory_space<vmem>>, vector<1x128xf32>
    %13 = vector.broadcast %12 : vector<1x128xf32> to vector<16x128xf32>
    %14 = arith.addf %11, %13 : vector<16x128xf32>
    %cst_11 = arith.constant 0.000000e+00 : f32
    %15 = vector.broadcast %cst_11 : f32 to vector<16x128xf32>
    %16 = arith.maximumf %14, %15 : vector<16x128xf32>
    %17 = arith.truncf %16 : vector<16x128xf32> to vector<16x128xbf16>
    %c0_12 = arith.constant 0 : index
    %c0_13 = arith.constant 0 : index
    %18 = vector.load %arg6[%c0_12, %c0_13] : memref<128x128xbf16, #tpu.memory_space<vmem>>, vector<128x128xbf16>
    %cst_14 = arith.constant dense<0.000000e+00> : vector<16x128xf32>
    %19 = tpu.matmul %17, %18, %cst_14 {dimension_numbers = #tpu.dot_dimension_numbers<[1], [0], [0], [1], [0, 0, 1, 1], [], []>} : vector<16x128xbf16>, vector<128x128xbf16>, vector<16x128xf32> -> vector<16x128xf32>
    %c0_15 = arith.constant 0 : index
    %c0_16 = arith.constant 0 : index
    %20 = vector.load %arg7[%c0_15, %c0_16] : memref<1x128xf32, #tpu.memory_space<vmem>>, vector<1x128xf32>
    %21 = vector.broadcast %20 : vector<1x128xf32> to vector<16x128xf32>
    %22 = arith.addf %19, %21 : vector<16x128xf32>
    %23 = tpu.iota {dimensions = array<i32: 1>} : vector<16x128xi32>
    %c16_i32 = arith.constant 16 : i32
    %24 = vector.broadcast %c16_i32 : i32 to vector<16x128xi32>
    %25 = arith.cmpi sge, %23, %24 : vector<16x128xi32>
    %26 = math.exp %22 : vector<16x128xf32>
    %27 = arith.select %25, %26, %22 : vector<16x128xi1>, vector<16x128xf32>
    %28 = arith.truncf %27 : vector<16x128xf32> to vector<16x128xbf16>
    %c0_17 = arith.constant 0 : index
    %c0_18 = arith.constant 0 : index
    %29 = vector.load %arg8[%c0_17, %c0_18] : memref<16x128xbf16, #tpu.memory_space<vmem>>, vector<16x128xbf16>
    tpu.vector_store %arg8[%c0_17, %c0_18], %28 {strides = array<i32>} : memref<16x128xbf16, #tpu.memory_space<vmem>>, vector<16x128xbf16>,
    return
  }
  func.func @transform_0(%arg0: i32) -> (i32, i32) {
    %c0_i32 = arith.constant 0 : i32
    %c0_i32_0 = arith.constant 0 : i32
    return %arg0, %c0_i32 : i32, i32
  }
  func.func @transform_1(%arg0: i32) -> (i32, i32) {
    %c0_i32 = arith.constant 0 : i32
    %c0_i32_0 = arith.constant 0 : i32
    %c0_i32_1 = arith.constant 0 : i32
    return %c0_i32, %c0_i32_0 : i32, i32
  }
  func.func @transform_2(%arg0: i32) -> (i32, i32) {
    %c0_i32 = arith.constant 0 : i32
    %c0_i32_0 = arith.constant 0 : i32
    %c0_i32_1 = arith.constant 0 : i32
    return %c0_i32, %c0_i32_0 : i32, i32
  }
  func.func @transform_3(%arg0: i32) -> (i32, i32) {
    %c0_i32 = arith.constant 0 : i32
    %c0_i32_0 = arith.constant 0 : i32
    %c0_i32_1 = arith.constant 0 : i32
    return %c0_i32, %c0_i32_0 : i32, i32
  }
  func.func @transform_4(%arg0: i32) -> (i32, i32) {
    %c0_i32 = arith.constant 0 : i32
    %c0_i32_0 = arith.constant 0 : i32
    %c0_i32_1 = arith.constant 0 : i32
    return %c0_i32, %c0_i32_0 : i32, i32
  }
  func.func @transform_5(%arg0: i32) -> (i32, i32) {
    %c0_i32 = arith.constant 0 : i32
    %c0_i32_0 = arith.constant 0 : i32
    %c0_i32_1 = arith.constant 0 : i32
    return %c0_i32, %c0_i32_0 : i32, i32
  }
  func.func @transform_6(%arg0: i32) -> (i32, i32) {
    %c0_i32 = arith.constant 0 : i32
    %c0_i32_0 = arith.constant 0 : i32
    %c0_i32_1 = arith.constant 0 : i32
    return %c0_i32, %c0_i32_0 : i32, i32
  }
  func.func @transform_7(%arg0: i32) -> (i32, i32) {
    %c0_i32 = arith.constant 0 : i32
    %c0_i32_0 = arith.constant 0 : i32
    return %arg0, %c0_i32 : i32, i32
  }
}

</mosaic_0001>

<bundles_post_ra>
// kernel: tpu_custom_call.1
= control target key start
LH: loop header
LB: loop body
LE: loop exit
PB: predicated region body
PF: predicated region fallthrough
CT: control target
= control target key end

     0   :  { %12 = vsyncpa [#allocation3], 0  ;;  %s836_s0 = inlined_call_operand.hbm [shape: f32[16,32], index: 0, kind: input, shape index: {}]   ;;  %s837_s1 = inlined_call_operand.hbm [shape: bf16[32,128], index: 1, kind: input, shape index: {}]   ;;  %s838_s2 = inlined_call_operand.vmem [shape: f32[1,128], index: 2, kind: input, shape index: {}]   ;;  %s839_s3 = inlined_call_operand.hbm [shape: bf16[128,128], index: 3, kind: input, shape index: {}]   ;;  %s840_s4 = inlined_call_operand.vmem [shape: f32[1,128], index: 4, kind: input, shape index: {}]   ;;  %s841_s5 = inlined_call_operand.hbm [shape: bf16[128,128], index: 5, kind: input, shape index: {}]   ;;  %s842_s6 = inlined_call_operand.vmem [shape: f32[1,128], index: 6, kind: input, shape index: {}]   ;;  %s843_s7 = inlined_call_operand.hbm [shape: bf16[16,128], index: 7, kind: output, shape index: {}]  }
   0x1   :  { %13 = vsyncpa [#allocation6], 0 }
   0x2   :  { %14 = vsyncpa [#allocation9], 0 }
   0x3   :  { %15 = vsyncpa [#allocation4], 0  ;;  %s673_s24 = smov [#allocation5]   ;;  %s555_s28 = scalar_lea.hbm %s837_s1, 256 }
   0x4   :  { %s33_s25 = sshll.u32 %s673_s24, 4  ;;  %p556_p0 = scmp.ne.s32.totalorder %s837_s1, %s555_s28  ;;  %s34_s25 = int_to_ptr.vmem [resolvable:$true] %s33_s25 }
   0x5   :  { %p559_p1 = scmp.lt.u32.totalorder %s555_s28, %s837_s1 }
   0x7   :  { %p561_p2 = pnand %p559_p1, %p556_p0 }
   0x9   :  { %564 = shalt.err (!%p561_p2)
}
   0xa   :  { %s565_s10 = scalar_lea.vmem %s34_s25, 256  ;;  %p570_p4 = scmp.lt.s32.totalorder %s34_s25, %s34_s25 }
   0xb   :  { %p566_p3 = scmp.ne.s32.totalorder %s34_s25, %s565_s10  ;;  %p571_p5 = scmp.lt.s32.totalorder %s565_s10, %s565_s10 }
   0xd   :  { %p572_p6 = por %p571_p5, %p570_p4 }
   0xf   :  { %p573_p7 = pnand %p572_p6, %p566_p3 }
  0x11   :  { %576 = shalt.err (!%p573_p7)
}
  0x12   :  { %s674_s11 = smov 64   ;;  %s675_s12 = smov 4  }
  0x13   :  { %39 = dma.hbm_to_vmem [thread:$0]  %s837_s1, 256, %s34_s25, [#allocation6], %s674_s11, %s674_s11, %s675_s12  }
  0x14   :  { %s676_s15 = smov [#allocation2]   ;;  %s577_s19 = scalar_lea.hbm %s836_s0, 256 }
  0x15   :  { %s21_s16 = sshll.u32 %s676_s15, 4  ;;  %p578_p8 = scmp.ne.s32.totalorder %s836_s0, %s577_s19  ;;  %s22_s16 = int_to_ptr.vmem [resolvable:$true] %s21_s16 }
  0x16   :  { %p581_p9 = scmp.lt.u32.totalorder %s577_s19, %s836_s0 }
  0x18   :  { %p583_p10 = pnand %p581_p9, %p578_p8 }
  0x1a   :  { %586 = shalt.err (!%p583_p10)
}
  0x1b   :  { %s587_s24 = scalar_lea.vmem %s22_s16, 256  ;;  %p592_p12 = scmp.lt.s32.totalorder %s22_s16, %s22_s16 }
  0x1c   :  { %p588_p11 = scmp.ne.s32.totalorder %s22_s16, %s587_s24  ;;  %p593_p13 = scmp.lt.s32.totalorder %s587_s24, %s587_s24 }
  0x1e   :  { %p594_p0 = por %p593_p13, %p592_p12 }
  0x20   :  { %p595_p1 = pnand %p594_p0, %p588_p11 }
  0x22   :  { %598 = shalt.err (!%p595_p1)
}
  0x23   :  { %s677_s1 = smov 128   ;;  %s678_s25 = smov 8  }
  0x24   :  { %27 = dma.hbm_to_vmem [thread:$0]  %s836_s0, 256, %s22_s16, [#allocation3], %s677_s1, %s677_s1, %s678_s25  }
  0x25   :  { %s679_s28 = smov [#allocation7]   ;;  %s680_s30 = smov [#allocation8]  }
  0x26   :  { %s47_s29 = sshll.u32 %s679_s28, 4  ;;  %s61_s8 = sshll.u32 %s680_s30, 4  ;;  %s48_s29 = int_to_ptr.vmem [resolvable:$true] %s47_s29  ;;  %s751_s8 = int_to_ptr.vmem [resolvable:$true] %s61_s8 }
  0x27   :  { %s599_s13 = scalar_lea.hbm %s839_s3, 1024 }
  0x28   :  { %p600_p2 = scmp.ne.s32.totalorder %s839_s3, %s599_s13  ;;  %p603_p3 = scmp.lt.u32.totalorder %s599_s13, %s839_s3 }
  0x2a   :  { %p605_p4 = pnand %p603_p3, %p600_p2 }
  0x2c   :  { %608 = shalt.err (!%p605_p4)
}
  0x2d   :  { %s609_s0 = scalar_lea.vmem %s48_s29, 1024  ;;  %p614_p6 = scmp.lt.s32.totalorder %s48_s29, %s48_s29 }
  0x2e   :  { %p610_p5 = scmp.ne.s32.totalorder %s48_s29, %s609_s0  ;;  %p615_p7 = scmp.lt.s32.totalorder %s609_s0, %s609_s0 }
  0x30   :  { %p616_p8 = por %p615_p7, %p614_p6 }
  0x32   :  { %p617_p9 = pnand %p616_p8, %p610_p5 }
  0x34   :  { %620 = shalt.err (!%p617_p9)
}
  0x35   :  { %53 = dma.hbm_to_vmem [thread:$0]  %s839_s3, 1024, %s48_s29, [#allocation6], %s674_s11, %s674_s11, %s675_s12  }
  0x36   :  { %s621_s22 = scalar_lea.hbm %s841_s5, 1024 }
  0x37   :  { %p622_p10 = scmp.ne.s32.totalorder %s841_s5, %s621_s22  ;;  %p625_p11 = scmp.lt.u32.totalorder %s621_s22, %s841_s5 }
  0x39   :  { %p627_p12 = pnand %p625_p11, %p622_p10 }
  0x3b   :  { %630 = shalt.err (!%p627_p12)
}
  0x3c   :  { %s631_s26 = scalar_lea.vmem %s751_s8, 1024  ;;  %p636_p0 = scmp.lt.s32.totalorder %s751_s8, %s751_s8 }
  0x3d   :  { %p632_p13 = scmp.ne.s32.totalorder %s751_s8, %s631_s26  ;;  %p637_p1 = scmp.lt.s32.totalorder %s631_s26, %s631_s26 }
  0x3f   :  { %p638_p2 = por %p637_p1, %p636_p0 }
  0x41   :  { %p639_p3 = pnand %p638_p2, %p632_p13 }
  0x43   :  { %642 = shalt.err (!%p639_p3)
}
  0x44   :  { %67 = dma.hbm_to_vmem [thread:$0]  %s841_s5, 1024, %s751_s8, [#allocation9], %s674_s11, %s674_s11, %s675_s12  }
  0x45   :  { %665 = dma.done.wait [#allocation3], 256  }
  0x46   :  { %666 = vsyncadd [#allocation3], 4294967040 }
  0x47   :  { %667 = dma.done.wait [#allocation6], 1280  }
  0x48   :  { %668 = vsyncadd [#allocation6], 4294966016 }
  0x49   :  { %669 = dma.done.wait [#allocation9], 1024  }
  0x4a   :  { %670 = vsyncadd [#allocation9], 4294966272  ;;  %v681_v0 = vmov 0.0   ;;  %vm682_vm0 = vmmov 0   ;;  %v533_v1 = vld [vmem:[#allocation5] sm:$0xff]   ;;  %v534_v2 = vld [vmem:[#allocation5 + $0x8] sm:$0xff]   ;;  %v384_v51 = vlaneseq }
  0x4b   :  { %474 = vmatprep.subr.bf16.mxu0 %v681_v0  ;;  %478 = vmatprep.mubr.msk.bf16.mxu0 %vm682_vm0, %v681_v0  ;;  %v83_v3 = vld [vmem:[#allocation2] sm:$0xff]  ;;  %v84_v4 = vld [vmem:[#allocation2 + $0x8] sm:$0xff]  ;;  %vm109_vm1 = vcmask 261120   ;;  %v537_v8 = vld [vmem:[#allocation7 + $0x10] sm:$0xff]  }
  0x4c   :  { %482 = vmatprep.subr.bf16.mxu1 %v681_v0  ;;  %498 = vmatprep.mubr.msk.bf16.mxu1 %vm682_vm0, %v681_v0  ;;  %v535_v5 = vld [vmem:[#allocation7] sm:$0xff]   ;;  %v85_v6 = vpack.c.bf16 %v84_v4, %v83_v3  ;;  %v536_v7 = vld [vmem:[#allocation7 + $0x8] sm:$0xff]   ;;  %v538_v9 = vld [vmem:[#allocation7 + $0x18] sm:$0xff]   ;;  %v385_v52 = vand.u32 127, %v384_v51 }
  0x4d   :  { %475 = vmatpush3.bf16.msra.mxu0 %v533_v1  ;;  %483 = vmatpush3.bf16.msra.mxu1 %v535_v5  ;;  %v539_v10 = vld [vmem:[#allocation7 + $0x20] sm:$0xff]   ;;  %v540_v11 = vld [vmem:[#allocation7 + $0x28] sm:$0xff]   ;;  %v541_v12 = vld [vmem:[#allocation7 + $0x30] sm:$0xff]  }
  0x4e   :  { %476 = vmatprep.subr.bf16.mxu0 %v681_v0  ;;  %484 = vmatprep.subr.bf16.mxu1 %v681_v0  ;;  %v542_v13 = vld [vmem:[#allocation7 + $0x38] sm:$0xff]   ;;  %v543_v14 = vld [vmem:[#allocation8] sm:$0xff]   ;;  %v544_v15 = vld [vmem:[#allocation8 + $0x8] sm:$0xff]   ;;  %vm386_vm2 = vcmp.ge.s32.totalorder %v385_v52, 16 }
  0x4f   :  { %v545_v16 = vld [vmem:[#allocation8 + $0x10] sm:$0xff]   ;;  %v546_v17 = vld [vmem:[#allocation8 + $0x18] sm:$0xff]   ;;  %v547_v18 = vld [vmem:[#allocation8 + $0x20] sm:$0xff]  }
  0x50   :  { %v548_v19 = vld [vmem:[#allocation8 + $0x28] sm:$0xff]   ;;  %v422_v20 = vld [vmem:[%s838_s2] ss:$0 sm:$0xff]  ;;  %v549_v30 = vld [vmem:[#allocation8 + $0x30] sm:$0xff]  }
  0x51   :  { %477 = vmatpush3.bf16.msra.mxu0 %v534_v2  ;;  %485 = vmatpush3.bf16.msra.mxu1 %v536_v7  ;;  %v550_v31 = vld [vmem:[#allocation8 + $0x38] sm:$0xff]   ;;  %v426_v32 = vld [vmem:[%s840_s4] ss:$0 sm:$0xff]  ;;  %s683_s4 = smov [#allocation10]  }
  0x52   :  { %502 = vmatprep.subr.bf16.mxu0 %v681_v0  ;;  %486 = vmatprep.subr.bf16.mxu1 %v681_v0  ;;  %v435_v42 = vld [vmem:[%s842_s6] ss:$0 sm:$0xff]  ;;  %s408_s9 = sshll.u32 %s683_s4, 4  ;;  %s409_s9 = int_to_ptr.vmem [resolvable:$true] %s408_s9 }
  0x53   :  { %s643_s6 = scalar_lea.vmem %s409_s9, 128  ;;  %p648_p5 = scmp.lt.s32.totalorder %s409_s9, %s409_s9 }
  0x54   :  { %479 = vmatmul.mubr.msk.bf16.vlgmr.msra.gmra.mrb[0].mxu0 %vm109_vm1, %v85_v6  ;;  %p644_p4 = scmp.ne.s32.totalorder %s409_s9, %s643_s6  ;;  %p649_p6 = scmp.lt.s32.totalorder %s643_s6, %s643_s6 }
  0x55   :  { %518 = vmatprep.mubr.msk.bf16.mxu0 %vm682_vm0, %v681_v0  ;;  %487 = vmatpush3.bf16.msra.mxu1 %v537_v8 }
  0x56   :  { %488 = vmatprep.subr.bf16.mxu1 %v681_v0  ;;  %503 = vmatpush3.bf16.msra.mxu0 %v543_v14  ;;  %p650_p7 = por %p649_p6, %p648_p5 }
  0x57   :  { %504 = vmatprep.subr.bf16.mxu0 %v681_v0 }
  0x58   :  { %p651_p8 = pnand %p650_p7, %p644_p4 }
  0x59   :  { %489 = vmatpush3.bf16.msra.mxu1 %v538_v9 }
  0x5a   :  { %490 = vmatprep.subr.bf16.mxu1 %v681_v0  ;;  %505 = vmatpush3.bf16.msra.mxu0 %v544_v15 }
  0x5b   :  { %506 = vmatprep.subr.bf16.mxu0 %v681_v0 }
  0x5d   :  { %491 = vmatpush3.bf16.msra.mxu1 %v539_v10 }
  0x5e   :  { %492 = vmatprep.subr.bf16.mxu1 %v681_v0  ;;  %507 = vmatpush3.bf16.msra.mxu0 %v545_v16 }
  0x5f   :  { %508 = vmatprep.subr.bf16.mxu0 %v681_v0 }
  0x61   :  { %493 = vmatpush3.bf16.msra.mxu1 %v540_v11 }
  0x62   :  { %494 = vmatprep.subr.bf16.mxu1 %v681_v0  ;;  %509 = vmatpush3.bf16.msra.mxu0 %v546_v17 }
  0x63   :  { %510 = vmatprep.subr.bf16.mxu0 %v681_v0 }
  0x65   :  { %495 = vmatpush3.bf16.msra.mxu1 %v541_v12 }
  0x66   :  { %496 = vmatprep.subr.bf16.mxu1 %v681_v0  ;;  %511 = vmatpush3.bf16.msra.mxu0 %v547_v18 }
  0x67   :  { %512 = vmatprep.subr.bf16.mxu0 %v681_v0 }
  0x69   :  { %497 = vmatpush3.bf16.msra.mxu1 %v542_v13 }
  0x6a   :  { %513 = vmatpush3.bf16.msra.mxu0 %v548_v19 }
  0x6b   :  { %514 = vmatprep.subr.bf16.mxu0 %v681_v0 }
  0x6e   :  { %515 = vmatpush3.bf16.msra.mxu0 %v549_v30 }
  0x6f   :  { %516 = vmatprep.subr.bf16.mxu0 %v681_v0 }
  0x72   :  { %517 = vmatpush3.bf16.msra.mxu0 %v550_v31 }
 0x127   :  { %v147_v21 = vpop.f32.mrb[0].mxu0 }
 0x128   :  { %v148_v22 = vadd.f32 %v422_v20, %v147_v21  ;;  %v480_v23 = vpop.f32.mrb[1].mxu0 }
 0x129   :  { %v150_v24 = vpop.f32.mrb[2].mxu0 }
 0x12a   :  { %v151_v25 = vadd.f32 %v422_v20, %v150_v24  ;;  %v481_v26 = vpop.f32.mrb[3].mxu0  ;;  %v154_v27 = vmax.f32 %v148_v22, 0.0 }
 0x12c   :  { %v155_v28 = vmax.f32 %v151_v25, 0.0 }
 0x12e   :  { %v156_v29 = vpack.c.bf16 %v155_v28, %v154_v27 }
 0x130   :  { %499 = vmatmul.mubr.bf16.vlgmr.msra.gmra.mrb[0].mxu1 %v156_v29 }
 0x203   :  { %v262_v33 = vpop.f32.mrb[0].mxu1 }
 0x204   :  { %v263_v34 = vadd.f32 %v426_v32, %v262_v33  ;;  %v500_v35 = vpop.f32.mrb[1].mxu1 }
 0x205   :  { %v265_v36 = vpop.f32.mrb[2].mxu1 }
 0x206   :  { %v266_v37 = vadd.f32 %v426_v32, %v265_v36  ;;  %v501_v38 = vpop.f32.mrb[3].mxu1  ;;  %v269_v39 = vmax.f32 %v263_v34, 0.0 }
 0x208   :  { %v270_v40 = vmax.f32 %v266_v37, 0.0 }
 0x20a   :  { %v271_v41 = vpack.c.bf16 %v270_v40, %v269_v39 }
 0x20c   :  { %519 = vmatmul.mubr.bf16.vlgmr.msra.gmra.mrb[4].mxu0 %v271_v41 }
 0x2df   :  { %v377_v43 = vpop.f32.mrb[4].mxu0 }
 0x2e0   :  { %v378_v44 = vadd.f32 %v435_v42, %v377_v43  ;;  %v520_v45 = vpop.f32.mrb[5].mxu0 }
 0x2e1   :  { %v380_v46 = vpop.f32.mrb[6].mxu0 }
 0x2e2   :  { %v387_v47 = vmul.f32 1.442695, %v378_v44  ;;  %v381_v48 = vadd.f32 %v435_v42, %v380_v46  ;;  %v521_v49 = vpop.f32.mrb[7].mxu0 }
 0x2e4   :  { %551 = vpow2.f32 %v387_v47  ;;  %v389_v50 = vmul.f32 1.442695, %v381_v48 }
 0x2e6   :  { %553 = vpow2.f32 %v389_v50 }
 0x2ee   :  { %v552_v53 = vpop.eup %551 }
 0x2ef   :  { %v391_v55 = vsel %vm386_vm2, %v552_v53, %v378_v44 }
 0x2f0   :  { %v554_v54 = vpop.eup %553 }
 0x2f1   :  { %v392_v56 = vsel %vm386_vm2, %v554_v54, %v381_v48 }
 0x2f2   :  { %v451_v57 = vpack.c.bf16 %v392_v56, %v391_v55 }
 0x2f4   :  { %452 = vst [vmem:[#allocation10] sm:$0xff] %v451_v57  }
 0x2f5   :  { %654 = shalt.err (!%p651_p8)
}
 0x2f6   :  { %s655_s14 = scalar_lea.hbm %s843_s7, 128 }
 0x2f7   :  { %p656_p9 = scmp.ne.s32.totalorder %s843_s7, %s655_s14  ;;  %p659_p10 = scmp.lt.u32.totalorder %s655_s14, %s843_s7 }
 0x2f9   :  { %p661_p11 = pnand %p659_p10, %p656_p9 }
 0x2fb   :  { %664 = shalt.err (!%p661_p11)
}
 0x2fc   :  { %414 = dma.vmem_to_hbm [thread:$0]  %s409_s9, 128, %s843_s7, [#allocation4], %s674_s11, %s674_s11, %s675_s12  }
 0x2fd   :  { %671 = dma.done.wait [#allocation4], 128  }
 0x2fe   :  { %672 = vsyncadd [#allocation4], 4294967168 }
 0x2ff   :  { %418 = vsyncpa [#allocation3], 1 }
 0x300   :  { %419 = vsyncpa [#allocation6], 1 }
 0x301   :  { %420 = vsyncpa [#allocation9], 1 }
 0x302   :  { %421 = vsyncpa [#allocation4], 1 }

</bundles_post_ra>
